<compile_context>
chip_gen: v6e
topology: v6e:2x2x1
jax: 0.10.0
libtpu: 0.0.40
codegen_flags: <defaults>
</compile_context>

<pallas_src>
import math
import functools

import jax
import jax.numpy as jnp
from jax import lax
from jax.experimental import pallas as pl
from jax.experimental.pallas import tpu as pltpu


NEG = -1e30  # safe large-negative additive mask (exp() underflows to exactly 0 in f32)


# ------------------------------ in-kernel helpers ------------------------------

def _rms_f32(t, g):
    # lucidrains RMSNorm: F.normalize(t, dim=-1) * sqrt(dim) * gamma   (eps = 1e-12)
    nrm = jnp.sqrt(jnp.sum(t * t, axis=-1, keepdims=True))
    return t / jnp.maximum(nrm, 1e-12) * (float(t.shape[-1]) ** 0.5) * g


def _gelu_exact(x):
    # Exact (erf-based) GELU. erf via Abramowitz–Stegun 7.1.26 (|err| < 1.5e-7), built only
    # from ops guaranteed to lower in Mosaic (exp / mul / add / div / abs / where).
    z = x * (0.5 ** 0.5)
    sgn = jnp.where(z < 0.0, -1.0, 1.0)
    a = jnp.abs(z)
    t = 1.0 / (1.0 + 0.3275911 * a)
    poly = ((((1.061405429 * t - 1.453152027) * t + 1.421413741) * t
             - 0.284496736) * t + 0.254829592) * t
    erf = sgn * (1.0 - poly * jnp.exp(-a * a))
    return 0.5 * x * (1.0 + erf)


# ----------------------------- Pallas kernels -----------------------------

def _mha_kernel(*refs, H, dh, scale, fused_qkv, has_bias, qk_norm, null_kv, mxu_dtype):
    """Multi-head attention for one batch: all heads per grid step, head-merged output.

    Bias ((H,N,Lk), optional), additive key mask ((1,Lk)), per-head q/k RMSNorm (optional)
    and the cross-attention null-KV rank-1 term (optional) are all applied on-chip, so no
    (B,H,N,Lk) tensor ever touches HBM.
    """
    it = iter(refs)
    if fused_qkv:
        qkv_ref = next(it)
    else:
        q_ref = next(it)
        kv_ref = next(it)
    amask_ref = next(it)
    bias_ref = next(it) if has_bias else None
    qg_ref = next(it) if qk_norm else None
    kg_ref = next(it) if qk_norm else None
    nk_ref = next(it) if null_kv else None
    nv_ref = next(it) if null_kv else None
    o_ref = next(it)

    D = H * dh
    if fused_qkv:
        qkv = qkv_ref[0].astype(jnp.float32)                 # (N, 3D)
        q_all, k_all, v_all = qkv[:, :D], qkv[:, D:2 * D], qkv[:, 2 * D:]
    else:
        q_all = q_ref[0].astype(jnp.float32)                 # (N, D)
        kv = kv_ref[0].astype(jnp.float32)                   # (Lk, 2D)
        k_all, v_all = kv[:, :D], kv[:, D:]
    add_mask = amask_ref[0].astype(jnp.float32)              # (1, Lk)

    for h in range(H):
        sl = slice(h * dh, (h + 1) * dh)
        qh, kh, vh = q_all[:, sl], k_all[:, sl], v_all[:, sl]
        if qk_norm:
            qh = _rms_f32(qh, qg_ref[...].astype(jnp.float32))
            kh = _rms_f32(kh, kg_ref[...].astype(jnp.float32))

        # contract on the last dim of both operands -> no k transpose / relayout
        s = lax.dot_general(qh.astype(mxu_dtype), kh.astype(mxu_dtype),
                            (((1,), (1,)), ((), ())),
                            preferred_element_type=jnp.float32) * scale       # (N, Lk)
        if has_bias:
            s = s + bias_ref[h].astype(jnp.float32)
        s = s + add_mask

        if null_kv:
            nkh = nk_ref[...][:, sl].astype(jnp.float32)                      # (1, dh)
            nvh = nv_ref[...][:, sl].astype(jnp.float32)
            if qk_norm:
                nkh = _rms_f32(nkh, kg_ref[...].astype(jnp.float32))
            qh_r = qh.astype(mxu_dtype).astype(jnp.float32)
            nkh_r = nkh.astype(mxu_dtype).astype(jnp.float32)
            sn = jnp.sum(qh_r * nkh_r, axis=-1, keepdims=True) * scale        # (N, 1)
            m = jnp.maximum(jnp.max(s, axis=-1, keepdims=True), sn)
            p = jnp.exp(s - m)
            pn = jnp.exp(sn - m)
            l = jnp.sum(p, axis=-1, keepdims=True) + pn
            pn_r = pn.astype(mxu_dtype).astype(jnp.float32)
            nvh_r = nvh.astype(mxu_dtype).astype(jnp.float32)
            o_h = lax.dot_general(p.astype(mxu_dtype), vh.astype(mxu_dtype),
                                  (((1,), (0,)), ((), ())),
                                  preferred_element_type=jnp.float32) + pn_r * nvh_r
        else:
            m = jnp.max(s, axis=-1, keepdims=True)
            p = jnp.exp(s - m)
            l = jnp.sum(p, axis=-1, keepdims=True)
            o_h = lax.dot_general(p.astype(mxu_dtype), vh.astype(mxu_dtype),
                                  (((1,), (0,)), ((), ())),
                                  preferred_element_type=jnp.float32)

        # division via the EUP reciprocal; write into the head-merged (N, D) output slab
        o_ref[0, :, sl] = (o_h * pl.reciprocal(l, approx=True)).astype(o_ref.dtype)


def _rms_linear_kernel(x_ref, g_ref, w_ref, o_ref, *, mxu_dtype):
    """Fused RMSNorm + bias-free Linear over a tile of flattened rows."""
    x = x_ref[...].astype(jnp.float32)                       # (tm, Din)
    xn = _rms_f32(x, g_ref[...].astype(jnp.float32))
    o_ref[...] = jnp.dot(xn.astype(mxu_dtype), w_ref[...].astype(mxu_dtype),
                         preferred_element_type=jnp.float32).astype(o_ref.dtype)


def _ln_linear_kernel(x_ref, lnw_ref, lnb_ref, w_ref, o_ref, *, mxu_dtype):
    """Fused LayerNorm + bias-free Linear over a tile of flattened rows."""
    x = x_ref[...].astype(jnp.float32)
    mu = jnp.mean(x, axis=-1, keepdims=True)
    var = jnp.mean(jnp.square(x - mu), axis=-1, keepdims=True)
    xn = (x - mu) * lax.rsqrt(var + 1e-5) * lnw_ref[...].astype(jnp.float32) \
        + lnb_ref[...].astype(jnp.float32)
    o_ref[...] = jnp.dot(xn.astype(mxu_dtype), w_ref[...].astype(mxu_dtype),
                         preferred_element_type=jnp.float32).astype(o_ref.dtype)


def _linear_bias_res_kernel(x_ref, w_ref, b_ref, res_ref, o_ref, *, mxu_dtype):
    """Fused Linear + bias + residual add (attention output projection epilogue)."""
    y = jnp.dot(x_ref[...].astype(mxu_dtype), w_ref[...].astype(mxu_dtype),
                preferred_element_type=jnp.float32)
    o_ref[...] = (y + b_ref[...].astype(jnp.float32)
                  + res_ref[...].astype(jnp.float32)).astype(o_ref.dtype)


def _ff_kernel(x_ref, g_ref, scale_ref, shift_ref, gate_ref,
               w1_ref, b1_ref, w2_ref, b2_ref, o_ref, *, inner, mxu_dtype):
    """Whole FeedForward: RMSNorm -> FiLM -> W1 -> GEGLU (exact GELU) -> W2 -> gate -> +res."""
    x = x_ref[0].astype(jnp.float32)                          # (tl, D); also the residual
    xn = _rms_f32(x, g_ref[...].astype(jnp.float32))
    xn = xn * (scale_ref[0].astype(jnp.float32) + 1.0) + shift_ref[0].astype(jnp.float32)
    h = jnp.dot(xn.astype(mxu_dtype), w1_ref[...].astype(mxu_dtype),
                preferred_element_type=jnp.float32) + b1_ref[...].astype(jnp.float32)
    a, gt = h[:, :inner], h[:, inner:]                        # 128-aligned split (inner padded)
    hg = _gelu_exact(gt) * a
    y = jnp.dot(hg.astype(mxu_dtype), w2_ref[...].astype(mxu_dtype),
                preferred_element_type=jnp.float32) + b2_ref[...].astype(jnp.float32)
    o_ref[0] = (y * gate_ref[0].astype(jnp.float32) + x).astype(o_ref.dtype)


# ----------------------------- kernel wrappers -----------------------------

def _row_tile(m):
    return m if m <= 256 else 256


def pallas_rms_linear(x, g, w, *, mxu_dtype):
    """y = RMSNorm(x) @ w, x:[B,L,Din], w:[Din,Dout] (no bias)."""
    B, L, Din = x.shape
    Dout = w.shape[1]
    M = B * L
    tm = _row_tile(M)
    out = pl.pallas_call(
        functools.partial(_rms_linear_kernel, mxu_dtype=mxu_dtype),
        out_shape=jax.ShapeDtypeStruct((M, Dout), x.dtype),
        grid=(pl.cdiv(M, tm),),
        in_specs=[
            pl.BlockSpec((tm, Din), lambda i: (i, 0)),
            pl.BlockSpec((1, Din), lambda i: (0, 0)),
            pl.BlockSpec((Din, Dout), lambda i: (0, 0)),
        ],
        out_specs=pl.BlockSpec((tm, Dout), lambda i: (i, 0)),
        compiler_params=pltpu.CompilerParams(dimension_semantics=("parallel",)),
    )(x.reshape(M, Din), g.reshape(1, Din), w)
    return out.reshape(B, L, Dout)


def pallas_ln_linear(x, ln_w, ln_b, w, *, mxu_dtype):
    """y = LayerNorm(x) @ w, x:[B,L,Din], w:[Din,Dout] (no bias)."""
    B, L, Din = x.shape
    Dout = w.shape[1]
    M = B * L
    tm = _row_tile(M)
    out = pl.pallas_call(
        functools.partial(_ln_linear_kernel, mxu_dtype=mxu_dtype),
        out_shape=jax.ShapeDtypeStruct((M, Dout), x.dtype),
        grid=(pl.cdiv(M, tm),),
        in_specs=[
            pl.BlockSpec((tm, Din), lambda i: (i, 0)),
            pl.BlockSpec((1, Din), lambda i: (0, 0)),
            pl.BlockSpec((1, Din), lambda i: (0, 0)),
            pl.BlockSpec((Din, Dout), lambda i: (0, 0)),
        ],
        out_specs=pl.BlockSpec((tm, Dout), lambda i: (i, 0)),
        compiler_params=pltpu.CompilerParams(dimension_semantics=("parallel",)),
    )(x.reshape(M, Din), ln_w.reshape(1, Din), ln_b.reshape(1, Din), w)
    return out.reshape(B, L, Dout)


def pallas_linear_bias_res(x, w, b, res, *, mxu_dtype):
    """y = x @ w + b + res, x:[B,L,Din], w:[Din,Dout], res:[B,L,Dout]."""
    B, L, Din = x.shape
    Dout = w.shape[1]
    M = B * L
    tm = _row_tile(M)
    out = pl.pallas_call(
        functools.partial(_linear_bias_res_kernel, mxu_dtype=mxu_dtype),
        out_shape=jax.ShapeDtypeStruct((M, Dout), x.dtype),
        grid=(pl.cdiv(M, tm),),
        in_specs=[
            pl.BlockSpec((tm, Din), lambda i: (i, 0)),
            pl.BlockSpec((Din, Dout), lambda i: (0, 0)),
            pl.BlockSpec((1, Dout), lambda i: (0, 0)),
            pl.BlockSpec((tm, Dout), lambda i: (i, 0)),
        ],
        out_specs=pl.BlockSpec((tm, Dout), lambda i: (i, 0)),
        compiler_params=pltpu.CompilerParams(dimension_semantics=("parallel",)),
    )(x.reshape(M, Din), w, b.reshape(1, Dout), res.reshape(M, Dout))
    return out.reshape(B, L, Dout)


def pallas_self_attention(qkv, bias, add_mask, *, H, dh, mxu_dtype):
    """qkv:[B,N,3D], bias:(H,N,N), add_mask:(B,N) additive (0 / NEG). Returns [B,N,D]."""
    B, N, threeD = qkv.shape
    D = H * dh
    kernel = functools.partial(
        _mha_kernel, H=H, dh=dh, scale=1.0 / math.sqrt(dh),
        fused_qkv=True, has_bias=True, qk_norm=False, null_kv=False, mxu_dtype=mxu_dtype)
    return pl.pallas_call(
        kernel,
        out_shape=jax.ShapeDtypeStruct((B, N, D), qkv.dtype),
        grid=(B,),
        in_specs=[
            pl.BlockSpec((1, N, threeD), lambda i: (i, 0, 0)),
            pl.BlockSpec((1, 1, N), lambda i: (i, 0, 0)),
            pl.BlockSpec((H, N, N), lambda i: (0, 0, 0)),
        ],
        out_specs=pl.BlockSpec((1, N, D), lambda i: (i, 0, 0)),
        compiler_params=pltpu.CompilerParams(dimension_semantics=("parallel",)),
    )(qkv, add_mask.reshape(B, 1, N), bias)


def pallas_cross_attention(q, kv, add_mask, q_g, k_g, null_k, null_v, *, H, dh, mxu_dtype):
    """q:[B,N,D], kv:[B,Lc,2D], add_mask:(B,Lc); null KV handled in-kernel. Returns [B,N,D]."""
    B, N, D = q.shape
    Lk = kv.shape[1]
    kernel = functools.partial(
        _mha_kernel, H=H, dh=dh, scale=1.0 / math.sqrt(dh),
        fused_qkv=False, has_bias=False, qk_norm=True, null_kv=True, mxu_dtype=mxu_dtype)
    return pl.pallas_call(
        kernel,
        out_shape=jax.ShapeDtypeStruct((B, N, D), q.dtype),
        grid=(B,),
        in_specs=[
            pl.BlockSpec((1, N, D), lambda i: (i, 0, 0)),
            pl.BlockSpec((1, Lk, 2 * D), lambda i: (i, 0, 0)),
            pl.BlockSpec((1, 1, Lk), lambda i: (i, 0, 0)),
            pl.BlockSpec((1, dh), lambda i: (0, 0)),
            pl.BlockSpec((1, dh), lambda i: (0, 0)),
            pl.BlockSpec((1, D), lambda i: (0, 0)),
            pl.BlockSpec((1, D), lambda i: (0, 0)),
        ],
        out_specs=pl.BlockSpec((1, N, D), lambda i: (i, 0, 0)),
        compiler_params=pltpu.CompilerParams(dimension_semantics=("parallel",)),
    )(q, kv, add_mask.reshape(B, 1, Lk), q_g.reshape(1, dh), k_g.reshape(1, dh),
      null_k.reshape(1, D), null_v.reshape(1, D))


def _pad_geglu_weights(w1, b1, w2):
    """Zero-pad the GEGLU inner dim up to a multiple of 128 (exact, lane-aligned).
    In production this would be done once at weight-load time."""
    D, two_inner = w1.shape
    inner0 = two_inner // 2
    inner_p = ((inner0 + 127) // 128) * 128
    pad = inner_p - inner0
    if pad == 0:
        return w1, b1, w2, inner_p
    zc = jnp.zeros((D, pad), w1.dtype)
    w1p = jnp.concatenate([w1[:, :inner0], zc, w1[:, inner0:], zc], axis=1)
    zb = jnp.zeros((pad,), b1.dtype)
    b1p = jnp.concatenate([b1[:inner0], zb, b1[inner0:], zb], axis=0)
    w2p = jnp.concatenate([w2, jnp.zeros((pad, w2.shape[1]), w2.dtype)], axis=0)
    return w1p, b1p, w2p, inner_p


def pallas_feedforward(x, g, scale, shift, gate, w1, b1, w2, b2, *, mxu_dtype):
    """Fully fused FF block (includes the residual add, which is the kernel's own x input)."""
    B, L, D = x.shape
    w1p, b1p, w2p, inner_p = _pad_geglu_weights(w1, b1, w2)
    tl = L if L <= 256 else 256
    return pl.pallas_call(
        functools.partial(_ff_kernel, inner=inner_p, mxu_dtype=mxu_dtype),
        out_shape=jax.ShapeDtypeStruct((B, L, D), x.dtype),
        grid=(B, pl.cdiv(L, tl)),
        in_specs=[
            pl.BlockSpec((1, tl, D), lambda b, l: (b, l, 0)),
            pl.BlockSpec((1, D), lambda b, l: (0, 0)),
            pl.BlockSpec((1, 1, D), lambda b, l: (b, 0, 0)),
            pl.BlockSpec((1, 1, D), lambda b, l: (b, 0, 0)),
            pl.BlockSpec((1, 1, D), lambda b, l: (b, 0, 0)),
            pl.BlockSpec((D, 2 * inner_p), lambda b, l: (0, 0)),
            pl.BlockSpec((1, 2 * inner_p), lambda b, l: (0, 0)),
            pl.BlockSpec((inner_p, D), lambda b, l: (0, 0)),
            pl.BlockSpec((1, D), lambda b, l: (0, 0)),
        ],
        out_specs=pl.BlockSpec((1, tl, D), lambda b, l: (b, l, 0)),
        compiler_params=pltpu.CompilerParams(
            dimension_semantics=("parallel", "parallel")),
    )(x, g.reshape(1, D), scale.reshape(B, 1, D), shift.reshape(B, 1, D),
      gate.reshape(B, 1, D), w1p, b1p.reshape(1, 2 * inner_p), w2p, b2.reshape(1, D))


# -------------------------- plain-JAX glue / reference pieces --------------------------

def rms_norm(x, g):
    nrm = jnp.sqrt(jnp.sum(jnp.square(x), axis=-1, keepdims=True))
    return x / jnp.maximum(nrm, 1e-12) * (float(x.shape[-1]) ** 0.5) * g


def layer_norm(x, w, b, eps=1e-5):
    mu = jnp.mean(x, axis=-1, keepdims=True)
    var = jnp.mean(jnp.square(x - mu), axis=-1, keepdims=True)
    return (x - mu) * lax.rsqrt(var + eps) * w + b


def dynamic_position_bias(p, n):
    # DynamicPositionBias(dim=D//4, heads=H, depth=2, log_distance=False)
    # tiny MLP + data-dependent gather: kept as XLA glue (output is only (H, n, n)).
    pos = jnp.arange(-n + 1, n, dtype=jnp.float32)[:, None]            # (2n-1, 1)
    h = jax.nn.silu(pos @ p["dpb_w0"] + p["dpb_b0"])
    h = jax.nn.silu(h @ p["dpb_w1"] + p["dpb_b1"])
    h = h @ p["dpb_w2"] + p["dpb_b2"]                                   # (2n-1, H)
    idx = jnp.arange(n)[:, None] - jnp.arange(n)[None, :] + (n - 1)     # (n, n)
    bias = h[idx]                                                       # (n, n, H)
    return jnp.transpose(bias, (2, 0, 1))                               # (H, n, n)


# ------------------------- ConditionableTransformer (Pallas) -------------------------

def conditionable_transformer(params, x, *, time, context, context_mask, audio_mask,
                              dim_head, mxu_dtype=jnp.bfloat16):
    B, N, D = x.shape
    H = D // dim_head

    # small additive key masks built once (never broadcast to (B,H,N,Lk) in HBM)
    amask = jnp.where(audio_mask, 0.0, NEG).astype(jnp.float32)        # (B, N)
    cmask = jnp.where(context_mask, 0.0, NEG).astype(jnp.float32)      # (B, Lc)

    for p in params:
        # ----- self attention (Attention has no time conditioning; dropout=0 / eval) -----
        qkv = pallas_rms_linear(x, p["attn_norm_g"], p["attn_qkv_w"], mxu_dtype=mxu_dtype)
        bias = dynamic_position_bias(p, N)                              # (H, N, N)
        attn = pallas_self_attention(qkv, bias, amask, H=H, dh=dim_head, mxu_dtype=mxu_dtype)
        x = pallas_linear_bias_res(attn, p["attn_out_w"], p["attn_out_b"], x,
                                   mxu_dtype=mxu_dtype)

        # ----- cross attention -----
        q = pallas_rms_linear(x, p["ca_norm_g"], p["ca_q_w"], mxu_dtype=mxu_dtype)
        kv = pallas_ln_linear(context, p["ca_ctx_ln_w"], p["ca_ctx_ln_b"], p["ca_kv_w"],
                              mxu_dtype=mxu_dtype)
        ca = pallas_cross_attention(q, kv, cmask, p["ca_qnorm_g"], p["ca_knorm_g"],
                                    p["ca_null_kv"][0], p["ca_null_kv"][1],
                                    H=H, dh=dim_head, mxu_dtype=mxu_dtype)
        x = pallas_linear_bias_res(ca, p["ca_out_w"], p["ca_out_b"], x, mxu_dtype=mxu_dtype)

        # conv block is None (conformer=False in ConditionableTransformer) -> skipped

        # ----- feed-forward (time conditioned), fully fused incl. residual -----
        t = jax.nn.silu(time) @ p["ff_time_w"] + p["ff_time_b"]         # (B, 3D): tiny glue
        scale, shift, gate = jnp.split(t, 3, axis=-1)
        x = pallas_feedforward(x, p["ff_norm_g"], scale, shift, gate,
                               p["ff_w1"], p["ff_b1"], p["ff_w2"], p["ff_b2"],
                               mxu_dtype=mxu_dtype)
    return x


# ------------------------- pure-JAX reference (for verification) -------------------------

def reference_transformer(params, x, *, time, context, context_mask, audio_mask,
                          dim_head, mxu_dtype=jnp.float32):
    """Plain-JAX implementation following the PyTorch module. `mxu_dtype` mirrors the
    kernels' matmul-operand rounding so correctness can be isolated from quantization."""
    B, N, D = x.shape
    H = D // dim_head
    Lc = context.shape[1]
    cast = lambda a: a.astype(mxu_dtype)
    mm = lambda a, b: jnp.dot(cast(a), cast(b), preferred_element_type=jnp.float32)

    def split_heads(t, L):
        return t.reshape(B, L, H, dim_head).transpose(0, 2, 1, 3)

    def merge_heads(t):
        return t.transpose(0, 2, 1, 3).reshape(B, -1, D)

    def sdpa(q, k, v, *, bias=None, mask=None):
        s = jnp.einsum("bhnd,bhkd->bhnk", cast(q), cast(k),
                       preferred_element_type=jnp.float32) / math.sqrt(dim_head)
        if bias is not None:
            s = s + bias
        if mask is not None:
            s = jnp.where(mask[:, None, None, :], s, NEG)
        p = jax.nn.softmax(s, axis=-1)
        return jnp.einsum("bhnk,bhkd->bhnd", cast(p), cast(v),
                          preferred_element_type=jnp.float32)

    for p in params:
        # self attention
        res = x
        xn = rms_norm(x, p["attn_norm_g"])
        qkv = mm(xn, p["attn_qkv_w"])
        q, k, v = jnp.split(qkv, 3, axis=-1)
        q, k, v = (split_heads(t, N) for t in (q, k, v))
        bias = dynamic_position_bias(p, N)[None]                        # (1, H, N, N)
        out = sdpa(q, k, v, bias=bias, mask=audio_mask)
        x = mm(merge_heads(out), p["attn_out_w"]) + p["attn_out_b"] + res

        # cross attention
        res = x
        xn = rms_norm(x, p["ca_norm_g"])
        ctx = layer_norm(context, p["ca_ctx_ln_w"], p["ca_ctx_ln_b"])
        q = mm(xn, p["ca_q_w"])
        kv = mm(ctx, p["ca_kv_w"])
        k, v = jnp.split(kv, 2, axis=-1)
        q, k, v = split_heads(q, N), split_heads(k, Lc), split_heads(v, Lc)
        nk = jnp.broadcast_to(p["ca_null_kv"][0].reshape(1, H, 1, dim_head),
                              (B, H, 1, dim_head))
        nv = jnp.broadcast_to(p["ca_null_kv"][1].reshape(1, H, 1, dim_head),
                              (B, H, 1, dim_head))
        k = jnp.concatenate([nk, k], axis=2)
        v = jnp.concatenate([nv, v], axis=2)
        q = rms_norm(q, p["ca_qnorm_g"])
        k = rms_norm(k, p["ca_knorm_g"])
        cmask = jnp.pad(context_mask, ((0, 0), (1, 0)), constant_values=True)
        out = sdpa(q, k, v, mask=cmask)
        x = mm(merge_heads(out), p["ca_out_w"]) + p["ca_out_b"] + res

        # feed-forward
        res = x
        t = jax.nn.silu(time) @ p["ff_time_w"] + p["ff_time_b"]
        scale, shift, gate = jnp.split(t, 3, axis=-1)
        inner = p["ff_w2"].shape[0]
        xn = rms_norm(x, p["ff_norm_g"])
        xn = xn * (scale[:, None, :] + 1.0) + shift[:, None, :]
        h = mm(xn, p["ff_w1"]) + p["ff_b1"]
        a, gt = h[..., :inner], h[..., inner:]
        h = jax.nn.gelu(gt, approximate=False) * a
        x = (mm(h, p["ff_w2"]) + p["ff_b2"]) * gate[:, None, :] + res
    return x


# ------------------------------ parameter init ------------------------------

def init_params(key, dim, dim_context, dim_head, num_layers, time_cond_dim, ff_mult):
    heads = dim // dim_head
    pdim = dim // 4
    inner = int(dim * ff_mult * 2 / 3)
    layers = []
    for _ in range(num_layers):
        key, *ks = jax.random.split(key, 20)
        w = lambda k, shape, s=0.05: jax.random.normal(k, shape, jnp.float32) * s
        layers.append(dict(
            # self attention
            attn_norm_g=jnp.ones((dim,), jnp.float32),
            attn_qkv_w=w(ks[0], (dim, 3 * dim)),
            # NOTE: the original zero_init_'s to_out / time_cond make the block a no-op at
            # init; here they are small random so the kernels exercise a non-trivial path.
            attn_out_w=w(ks[1], (dim, dim)),
            attn_out_b=jnp.zeros((dim,), jnp.float32),
            # DynamicPositionBias MLP
            dpb_w0=w(ks[2], (1, pdim), 0.5), dpb_b0=w(ks[3], (pdim,), 0.5),
            dpb_w1=w(ks[4], (pdim, pdim), 0.3), dpb_b1=w(ks[5], (pdim,), 0.3),
            dpb_w2=w(ks[6], (pdim, heads), 0.3), dpb_b2=w(ks[7], (heads,), 0.3),
            # cross attention
            ca_norm_g=jnp.ones((dim,), jnp.float32),
            ca_ctx_ln_w=jnp.ones((dim_context,), jnp.float32),
            ca_ctx_ln_b=jnp.zeros((dim_context,), jnp.float32),
            ca_null_kv=w(ks[8], (2, dim), 1.0),
            ca_q_w=w(ks[9], (dim, dim)),
            ca_kv_w=w(ks[10], (dim_context, 2 * dim)),
            ca_out_w=w(ks[11], (dim, dim)),
            ca_out_b=jnp.zeros((dim,), jnp.float32),
            ca_qnorm_g=jnp.ones((dim_head,), jnp.float32),
            ca_knorm_g=jnp.ones((dim_head,), jnp.float32),
            # feed-forward with time conditioning
            ff_norm_g=jnp.ones((dim,), jnp.float32),
            ff_time_w=w(ks[12], (time_cond_dim, 3 * dim)),
            ff_time_b=jnp.zeros((3 * dim,), jnp.float32),
            ff_w1=w(ks[13], (dim, 2 * inner)),
            ff_b1=jnp.zeros((2 * inner,), jnp.float32),
            ff_w2=w(ks[14], (inner, dim)),
            ff_b2=jnp.zeros((dim,), jnp.float32),
        ))
    return layers


# ----------------------------------- main -----------------------------------

if __name__ == "__main__":
    B, N, D = 2, 8, 64          # batch, audio seq, model dim
    dim_head = 32               # -> 2 heads
    Dc, Lc = 48, 6              # context dim, text seq
    time_cond_dim = 32
    num_layers = 2
    ff_mult = 4

    key = jax.random.PRNGKey(0)
    kx, kc, kt, kp = jax.random.split(key, 4)
    x = jax.random.normal(kx, (B, N, D), jnp.float32)
    context = jax.random.normal(kc, (B, Lc, Dc), jnp.float32)
    time = jax.random.normal(kt, (B, time_cond_dim), jnp.float32)
    audio_mask = jnp.array([[True] * N, [True] * (N - 2) + [False] * 2])
    context_mask = jnp.array([[True] * Lc, [True] * (Lc - 2) + [False] * 2])

    params = init_params(kp, D, Dc, dim_head, num_layers, time_cond_dim, ff_mult)

    common = dict(time=time, context=context, context_mask=context_mask,
                  audio_mask=audio_mask, dim_head=dim_head)

    # 1) exact-semantics check: f32 MXU operands vs a pure-f32 reference
    out32 = conditionable_transformer(params, x, mxu_dtype=jnp.float32, **common)
    ref32 = reference_transformer(params, x, mxu_dtype=jnp.float32, **common)
    out32, ref32 = jax.block_until_ready((out32, ref32))
    assert out32.shape == (B, N, D)
    assert bool(jnp.all(jnp.isfinite(out32)))
    d32 = float(jnp.max(jnp.abs(out32 - ref32)))
    assert d32 < 1e-2, f"f32 Pallas vs reference mismatch: {d32}"

    # 2) performance path: bf16 MXU operands (f32 accumulation) vs a reference applying
    #    the same bf16 rounding at every matmul.
    out16 = conditionable_transformer(params, x, mxu_dtype=jnp.bfloat16, **common)
    ref16 = reference_transformer(params, x, mxu_dtype=jnp.bfloat16, **common)
    out16, ref16 = jax.block_until_ready((out16, ref16))
    assert bool(jnp.all(jnp.isfinite(out16)))
    d16 = float(jnp.max(jnp.abs(out16 - ref16)))
    assert d16 < 2e-2, f"bf16 Pallas vs matched reference mismatch: {d16}"

    print("KERNEL_OK")
</pallas_src>

<mosaic_0001>
module attributes {stable_mosaic.version = 11 : i64} {
  func.func @_rms_linear_kernel(%arg0: i32, %arg1: memref<16x64xf32, #tpu.memory_space<vmem>>, %arg2: memref<1x64xf32, #tpu.memory_space<vmem>>, %arg3: memref<64x192xf32, #tpu.memory_space<vmem>>, %arg4: memref<16x192xf32, #tpu.memory_space<vmem>>) attributes {dimension_semantics = [#tpu.dimension_semantics<parallel>], iteration_bounds = array<i64: 1>, scalar_prefetch = 0 : i64, scratch_operands = 0 : i64, tpu.core_type = #tpu.core_type<tc>, window_params = [{transform_indices = @transform_0, window_bounds = array<i64: 16, 64>}, {pipeline_mode = #tpu.pipeline_mode<synchronous>, transform_indices = @transform_1, window_bounds = array<i64: 1, 64>}, {pipeline_mode = #tpu.pipeline_mode<synchronous>, transform_indices = @transform_2, window_bounds = array<i64: 64, 192>}, {transform_indices = @transform_3, window_bounds = array<i64: 16, 192>}]} {
    %c0 = arith.constant 0 : index
    %c0_0 = arith.constant 0 : index
    %0 = vector.load %arg1[%c0, %c0_0] : memref<16x64xf32, #tpu.memory_space<vmem>>, vector<16x64xf32>
    %c0_1 = arith.constant 0 : index
    %c0_2 = arith.constant 0 : index
    %1 = vector.load %arg2[%c0_1, %c0_2] : memref<1x64xf32, #tpu.memory_space<vmem>>, vector<1x64xf32>
    %2 = arith.mulf %0, %0 : vector<16x64xf32>
    %cst = arith.constant dense<0.000000e+00> : vector<16xf32>
    %3 = vector.multi_reduction <add>, %2, %cst [1] : vector<16x64xf32> to vector<16xf32>
    %4 = vector.shape_cast %3 : vector<16xf32> to vector<16x1xf32>
    %5 = math.sqrt %4 : vector<16x1xf32>
    %cst_3 = arith.constant 9.99999996E-13 : f32
    %6 = vector.broadcast %cst_3 : f32 to vector<16x1xf32>
    %7 = arith.maximumf %5, %6 : vector<16x1xf32>
    %8 = vector.broadcast %7 : vector<16x1xf32> to vector<16x64xf32>
    %9 = arith.divf %0, %8 : vector<16x64xf32>
    %cst_4 = arith.constant 8.000000e+00 : f32
    %10 = vector.broadcast %cst_4 : f32 to vector<16x64xf32>
    %11 = arith.mulf %9, %10 : vector<16x64xf32>
    %12 = vector.broadcast %1 : vector<1x64xf32> to vector<16x64xf32>
    %13 = arith.mulf %11, %12 : vector<16x64xf32>
    %c0_5 = arith.constant 0 : index
    %c0_6 = arith.constant 0 : index
    %14 = vector.load %arg3[%c0_5, %c0_6] : memref<64x192xf32, #tpu.memory_space<vmem>>, vector<64x192xf32>
    %cst_7 = arith.constant dense<0.000000e+00> : vector<16x192xf32>
    %15 = tpu.matmul %13, %14, %cst_7 {dimension_numbers = #tpu.dot_dimension_numbers<[1], [0], [0], [1], [0, 0, 1, 1], [], []>} : vector<16x64xf32>, vector<64x192xf32>, vector<16x192xf32> -> vector<16x192xf32>
    %c0_8 = arith.constant 0 : index
    %c0_9 = arith.constant 0 : index
    %16 = vector.load %arg4[%c0_8, %c0_9] : memref<16x192xf32, #tpu.memory_space<vmem>>, vector<16x192xf32>
    tpu.vector_store %arg4[%c0_8, %c0_9], %15 {strides = array<i32>} : memref<16x192xf32, #tpu.memory_space<vmem>>, vector<16x192xf32>,
    return
  }
  func.func @transform_0(%arg0: i32) -> (i32, i32) {
    %c0_i32 = arith.constant 0 : i32
    %c0_i32_0 = arith.constant 0 : i32
    return %arg0, %c0_i32 : i32, i32
  }
  func.func @transform_1(%arg0: i32) -> (i32, i32) {
    %c0_i32 = arith.constant 0 : i32
    %c0_i32_0 = arith.constant 0 : i32
    %c0_i32_1 = arith.constant 0 : i32
    return %c0_i32, %c0_i32_0 : i32, i32
  }
  func.func @transform_2(%arg0: i32) -> (i32, i32) {
    %c0_i32 = arith.constant 0 : i32
    %c0_i32_0 = arith.constant 0 : i32
    %c0_i32_1 = arith.constant 0 : i32
    return %c0_i32, %c0_i32_0 : i32, i32
  }
  func.func @transform_3(%arg0: i32) -> (i32, i32) {
    %c0_i32 = arith.constant 0 : i32
    %c0_i32_0 = arith.constant 0 : i32
    return %arg0, %c0_i32 : i32, i32
  }
}

</mosaic_0001>

<bundles_post_ra>
// kernel: tpu_custom_call.1
= control target key start
LH: loop header
LB: loop body
LE: loop exit
PB: predicated region body
PF: predicated region fallthrough
CT: control target
= control target key end

     0   :  { %8 = vsyncpa [#allocation3], 0  ;;  %s369_s0 = inlined_call_operand.hbm [shape: f32[16,64], index: 0, kind: input, shape index: {}]   ;;  %s370_s1 = inlined_call_operand.vmem [shape: f32[1,64], index: 1, kind: input, shape index: {}]   ;;  %s371_s2 = inlined_call_operand.hbm [shape: f32[64,192], index: 2, kind: input, shape index: {}]   ;;  %s372_s3 = inlined_call_operand.hbm [shape: f32[16,192], index: 3, kind: output, shape index: {}]  }
   0x1   :  { %9 = vsyncpa [#allocation6], 0 }
   0x2   :  { %10 = vsyncpa [#allocation4], 0  ;;  %s307_s12 = smov [#allocation2]  }
   0x3   :  { %s16_s13 = sshll.u32 %s307_s12, 4  ;;  %s17_s13 = int_to_ptr.vmem [resolvable:$true] %s16_s13 }
   0x4   :  { %s249_s14 = scalar_lea.vmem %s17_s13, 256  ;;  %p254_p1 = scmp.lt.s32.totalorder %s17_s13, %s17_s13 }
   0x5   :  { %p250_p0 = scmp.ne.s32.totalorder %s17_s13, %s249_s14  ;;  %p255_p2 = scmp.lt.s32.totalorder %s249_s14, %s249_s14 }
   0x7   :  { %p256_p3 = por %p255_p2, %p254_p1 }
   0x9   :  { %p257_p4 = pnand %p256_p3, %p250_p0 }
   0xb   :  { %260 = shalt.err (!%p257_p4)
}
   0xc   :  { %s308_s15 = smov 128   ;;  %s309_s16 = smov 8  }
   0xd   :  { %22 = dma.hbm_to_vmem [thread:$0]  %s369_s0, 256, %s17_s13, [#allocation3], %s308_s15, %s308_s15, %s309_s16  }
   0xe   :  { %s310_s19 = smov [#allocation5]  }
   0xf   :  { %s30_s20 = sshll.u32 %s310_s19, 4  ;;  %s31_s20 = int_to_ptr.vmem [resolvable:$true] %s30_s20 }
  0x10   :  { %s269_s21 = scalar_lea.vmem %s31_s20, 2048  ;;  %p274_p6 = scmp.lt.s32.totalorder %s31_s20, %s31_s20 }
  0x11   :  { %p270_p5 = scmp.ne.s32.totalorder %s31_s20, %s269_s21  ;;  %p275_p7 = scmp.lt.s32.totalorder %s269_s21, %s269_s21 }
  0x13   :  { %p276_p8 = por %p275_p7, %p274_p6 }
  0x15   :  { %p277_p9 = pnand %p276_p8, %p270_p5 }
  0x17   :  { %280 = shalt.err (!%p277_p9)
}
  0x18   :  { %s311_s22 = smov 256   ;;  %s312_s23 = smov 16  }
  0x19   :  { %36 = dma.hbm_to_vmem [thread:$0]  %s371_s2, 2048, %s31_s20, [#allocation6], %s311_s22, %s311_s22, %s312_s23  }
  0x1a   :  { %301 = dma.done.wait [#allocation3], 256  }
  0x1b   :  { %302 = vsyncadd [#allocation3], 4294967040 }
  0x1c   :  { %303 = dma.done.wait [#allocation6], 2048  }
  0x1d   :  { %304 = vsyncadd [#allocation6], 4294965248  ;;  %v344_v0 = vld [vmem:[#allocation2] sm:$0xff]  ;;  %vm48_vm0 = vcmask 523264   ;;  %v346_v1 = vld [vmem:[#allocation2 + $0x8] sm:$0xff]  ;;  %v313_v22 = vmov 0.0  }
  0x1e   :  { %v46_v2 = vmul.f32 %v344_v0, %v344_v0  ;;  %v47_v3 = vmul.f32 %v346_v1, %v346_v1  ;;  %v100_v6 = vld [vmem:[#allocation5 + $0x78] sm:$0xff]  ;;  %v99_v7 = vld [vmem:[#allocation5 + $0x70] sm:$0xff]  ;;  %v98_v8 = vld [vmem:[#allocation5 + $0x68] sm:$0xff]  ;;  %171 = vmatprep.mubr.f32.mxu0 %v313_v22  ;;  %177 = vmatprep.mubr.f32.mxu1 %v313_v22  ;;  %s314_s26 = smov [#allocation7]  }
  0x1f   :  { %123 = vmatprep.subr.mxu0 %v100_v6  ;;  %v97_v9 = vld [vmem:[#allocation5 + $0x60] sm:$0xff]  ;;  %209 = vmatprep.subr.mxu1 %v100_v6  ;;  %v96_v10 = vld [vmem:[#allocation5 + $0x58] sm:$0xff]  ;;  %v95_v11 = vld [vmem:[#allocation5 + $0x50] sm:$0xff]  ;;  %s193_s27 = sshll.u32 %s314_s26, 4  ;;  %s194_s27 = int_to_ptr.vmem [resolvable:$true] %s193_s27 }
  0x20   :  { %v49_v4 = vsel %vm48_vm0, %v46_v2, 0.0  ;;  %v52_v5 = vsel %vm48_vm0, %v47_v3, 0.0  ;;  %124 = vmatpush1.msra.mxu0 %v99_v7  ;;  %217 = vmatpush1.msra.mxu1 %v99_v7  ;;  %v94_v12 = vld [vmem:[#allocation5 + $0x48] sm:$0xff]  ;;  %v93_v13 = vld [vmem:[#allocation5 + $0x40] sm:$0xff]  ;;  %v92_v14 = vld [vmem:[#allocation5 + $0x38] sm:$0xff]  ;;  %p286_p11 = scmp.lt.s32.totalorder %s194_s27, %s194_s27 }
  0x21   :  { %50 = vadd.xlane.f32.xlu0 %v49_v4  ;;  %125 = vmatprep.subr.mxu0 %v98_v8  ;;  %v91_v15 = vld [vmem:[#allocation5 + $0x30] sm:$0xff]  ;;  %v90_v16 = vld [vmem:[#allocation5 + $0x28] sm:$0xff]  ;;  %v89_v17 = vld [vmem:[#allocation5 + $0x20] sm:$0xff] }
  0x22   :  { %210 = vmatprep.subr.mxu1 %v98_v8  ;;  %126 = vmatpush1.msra.mxu0 %v97_v9  ;;  %v88_v18 = vld [vmem:[#allocation5 + $0x18] sm:$0xff]  ;;  %v87_v19 = vld [vmem:[#allocation5 + $0x10] sm:$0xff]  ;;  %v86_v20 = vld [vmem:[#allocation5 + $0x8] sm:$0xff] }
  0x23   :  { %218 = vmatpush1.msra.mxu1 %v97_v9  ;;  %127 = vmatprep.subr.mxu0 %v96_v10  ;;  %v85_v21 = vld [vmem:[#allocation5] sm:$0xff]  ;;  %v206_v39 = vld [vmem:[%s370_s1] ss:$0 sm:$0xff]  ;;  %s281_s1 = scalar_lea.vmem %s194_s27, 512 }
  0x24   :  { %211 = vmatprep.subr.mxu1 %v96_v10  ;;  %128 = vmatpush1.msra.mxu0 %v95_v11  ;;  %p282_p10 = scmp.ne.s32.totalorder %s194_s27, %s281_s1  ;;  %p287_p12 = scmp.lt.s32.totalorder %s281_s1, %s281_s1 }
  0x25   :  { %53 = vadd.xlane.f32.xlu0 %v52_v5  ;;  %219 = vmatpush1.msra.mxu1 %v95_v11 }
  0x26   :  { %129 = vmatprep.subr.mxu0 %v94_v12  ;;  %212 = vmatprep.subr.mxu1 %v94_v12  ;;  %p288_p13 = por %p287_p12, %p286_p11 }
  0x27   :  { %130 = vmatpush1.msra.mxu0 %v93_v13  ;;  %220 = vmatpush1.msra.mxu1 %v93_v13 }
  0x28   :  { %131 = vmatprep.subr.mxu0 %v92_v14  ;;  %213 = vmatprep.subr.mxu1 %v92_v14  ;;  %p289_p0 = pnand %p288_p13, %p282_p10 }
  0x29   :  { %132 = vmatpush1.msra.mxu0 %v91_v15  ;;  %221 = vmatpush1.msra.mxu1 %v91_v15 }
  0x2a   :  { %133 = vmatprep.subr.mxu0 %v90_v16  ;;  %214 = vmatprep.subr.mxu1 %v90_v16 }
  0x2b   :  { %134 = vmatpush1.msra.mxu0 %v89_v17  ;;  %222 = vmatpush1.msra.mxu1 %v89_v17 }
  0x2c   :  { %135 = vmatprep.subr.mxu0 %v88_v18  ;;  %215 = vmatprep.subr.mxu1 %v88_v18 }
  0x2d   :  { %136 = vmatpush1.msra.mxu0 %v87_v19  ;;  %223 = vmatpush1.msra.mxu1 %v87_v19 }
  0x2e   :  { %137 = vmatprep.subr.mxu0 %v86_v20  ;;  %216 = vmatprep.subr.mxu1 %v86_v20 }
  0x2f   :  { %138 = vmatpush1.msra.mxu0 %v85_v21  ;;  %224 = vmatpush1.msra.mxu1 %v85_v21 }
  0xaa   :  { %v51_v23 = vpop.xlane.xlu0 %50 }
  0xab   :  { %233 = vrsqrt.f32 %v51_v23  ;;  %vm57_vm1 = vcmp.eq.f32.partialorder %v51_v23, inf  ;;  %v60_v27 = vand.u32 2147483648, %v51_v23  ;;  %vm59_vm2 = vcmp.eq.f32.partialorder %v51_v23, 0.0 }
  0xae   :  { %v54_v24 = vpop.xlane.xlu0 %53 }
  0xaf   :  { %235 = vrsqrt.f32 %v54_v24  ;;  %vm64_vm3 = vcmp.eq.f32.partialorder %v54_v24, inf  ;;  %v67_v33 = vand.u32 2147483648, %v54_v24  ;;  %vm66_vm4 = vcmp.eq.f32.partialorder %v54_v24, 0.0 }
  0xb8   :  { %v234_v25 = vpop.eup %233 }
  0xb9   :  { %v56_v26 = vmul.f32 %v234_v25, %v51_v23 }
  0xbb   :  { %v58_v28 = vsel %vm57_vm1, %v51_v23, %v56_v26 }
  0xbc   :  { %v236_v29 = vpop.eup %235  ;;  %v61_v30 = vsel %vm59_vm2, %v60_v27, %v58_v28 }
  0xbd   :  { %v69_v31 = vmax.f32 %v61_v30, 1e-12  ;;  %v63_v32 = vmul.f32 %v236_v29, %v54_v24 }
  0xbf   :  { %237 = vrcp.f32 %v69_v31  ;;  %v65_v34 = vsel %vm64_vm3, %v54_v24, %v63_v32 }
  0xc0   :  { %v68_v35 = vsel %vm66_vm4, %v67_v33, %v65_v34 }
  0xc1   :  { %v70_v36 = vmax.f32 %v68_v35, 1e-12 }
  0xc3   :  { %239 = vrcp.f32 %v70_v36 }
  0xcc   :  { %v238_v37 = vpop.eup %237 }
  0xcd   :  { %v72_v38 = vmul.f32 %v238_v37, %v344_v0 }
  0xcf   :  { %v75_v40 = vmul.f32 8.0, %v72_v38 }
  0xd0   :  { %v240_v41 = vpop.eup %239 }
  0xd1   :  { %v83_v42 = vmul.f32 %v206_v39, %v75_v40  ;;  %v74_v43 = vmul.f32 %v240_v41, %v346_v1 }
  0xd3   :  { %207 = vmatmul.mubr.msk.f32.vlgmr.msra.gmra.mxu0 %vm48_vm0, %v83_v42  ;;  %v76_v44 = vmul.f32 8.0, %v74_v43 }
  0xd5   :  { %v84_v45 = vmul.f32 %v206_v39, %v76_v44 }
  0xd7   :  { %208 = vmatmul.mubr.msk.f32.vlgmr.msra.gmra.mxu1 %vm48_vm0, %v84_v45 }
 0x193   :  { %v173_v46 = vpop.f32.mrf.mxu0 }
 0x194   :  { %184 = vst [vmem:[#allocation7] sm:$0xff] %v173_v46 }
 0x195   :  { %v175_v47 = vpop.f32.mrf.mxu0 }
 0x196   :  { %185 = vst.msk [vmem:[#allocation7 + $0x8] sm:$0xff] %vm48_vm0, %v175_v47 }
 0x197   :  { %v179_v48 = vpop.f32.mrf.mxu1 }
 0x198   :  { %186 = vst [vmem:[#allocation7 + $0x10] sm:$0xff] %v179_v48 }
 0x199   :  { %v181_v49 = vpop.f32.mrf.mxu1 }
 0x19a   :  { %187 = vst.msk [vmem:[#allocation7 + $0x18] sm:$0xff] %vm48_vm0, %v181_v49 }
 0x19b   :  { %292 = shalt.err (!%p289_p0)
}
 0x19c   :  { %199 = dma.vmem_to_hbm [thread:$0]  %s194_s27, 512, %s372_s3, [#allocation4], %s311_s22, %s311_s22, %s312_s23  }
 0x19d   :  { %305 = dma.done.wait [#allocation4], 512  }
 0x19e   :  { %306 = vsyncadd [#allocation4], 4294966784 }
 0x19f   :  { %203 = vsyncpa [#allocation3], 1 }
 0x1a0   :  { %204 = vsyncpa [#allocation6], 1 }
 0x1a1   :  { %205 = vsyncpa [#allocation4], 1 }

</bundles_post_ra>
